<compile_context>
chip_gen: v7x
topology: tpu7x:2x2x1
jax: 0.10.0
libtpu: 0.0.40
codegen_flags: <defaults>
</compile_context>

<pallas_src>
import jax
import jax.numpy as jnp
import numpy as np
from jax import lax
from jax.experimental import pallas as pl
from jax.experimental.pallas import tpu as pltpu

EPS = 1e-5                      # PyTorch BatchNorm2d default eps
_VMEM_LIMIT = 32 * 1024 * 1024  # explicit scoped-VMEM budget; fits v5e/v6e/v7x


def _round_up(x, m):
    return (x + m - 1) // m * m


# ----------------------- Pallas kernels -----------------------

def _stats_matmul_kernel(x_ref, w_ref, stats_ref):
    """Fast path, pass 1: per-column sum / sum-of-squares of (x_tile @ W),
    accumulated across row tiles into a (2, Ncols) VMEM-resident accumulator."""
    @pl.when(pl.program_id(0) == 0)
    def _init():
        stats_ref[...] = jnp.zeros_like(stats_ref)

    cols = jnp.dot(x_ref[...], w_ref[...], preferred_element_type=jnp.float32)
    s1 = jnp.sum(cols, axis=0, keepdims=True)
    s2 = jnp.sum(cols * cols, axis=0, keepdims=True)
    stats_ref[...] += jnp.concatenate([s1, s2], axis=0)


def _matmul_bn_relu_kernel(x_ref, w_ref, scale_ref, bias_ref, o_ref):
    """Fast path, pass 2: recompute the tile matmul, apply folded BN affine + ReLU
    (one FMA + max per element), lane-dense (…,128k) output store."""
    cols = jnp.dot(x_ref[...], w_ref[...], preferred_element_type=jnp.float32)
    o_ref[...] = jnp.maximum(cols * scale_ref[...] + bias_ref[...], 0.0)


def _matmul_kernel(x_ref, w_ref, o_ref):
    """General path: plain tiled matmul producing the cols slab."""
    o_ref[...] = jnp.dot(x_ref[...], w_ref[...], preferred_element_type=jnp.float32)


def _bn_stats_kernel(y_ref, stats_ref):
    """General path: per-channel sum / sum-of-squares accumulated across row tiles."""
    @pl.when(pl.program_id(0) == 0)
    def _init():
        stats_ref[...] = jnp.zeros_like(stats_ref)

    y = y_ref[...]
    s1 = jnp.sum(y, axis=0, keepdims=True)
    s2 = jnp.sum(y * y, axis=0, keepdims=True)
    stats_ref[...] += jnp.concatenate([s1, s2], axis=0)


def _bn_apply_kernel(y_ref, scale_ref, bias_ref, o_ref):
    """General path: folded BN affine + ReLU, tiled over rows."""
    o_ref[...] = jnp.maximum(y_ref[...] * scale_ref[...] + bias_ref[...], 0.0)


# ----------------------- forward paths -----------------------

def _fold_bn(gamma, beta, mean, var):
    scale = gamma.astype(jnp.float32) * lax.rsqrt(var + EPS)
    bias = beta.astype(jnp.float32) - mean * scale
    return scale, bias


def _up_block_fused(x, weight, gamma, beta, row_tile, matmul_dtype):
    """stride == kH == kW: conv-transpose + BN + ReLU fully fused in two Pallas passes."""
    N, Cin, H, W = x.shape
    _, Cout, kH, kW = weight.shape
    H_out, W_out = H * kH, W * kW
    M = N * H * W
    Ncols = Cout * kH * kW
    Ncols_pad = _round_up(Ncols, 128)           # lane-dense output stores

    tm = min(_round_up(row_tile, 8), _round_up(M, 8))
    M_pad = _round_up(M, tm)
    n_tiles = M_pad // tm

    # channels-last rows; zero-padded rows contribute nothing to the statistics.
    x2d = jnp.transpose(x, (0, 2, 3, 1)).reshape(M, Cin)
    x2d = jnp.pad(x2d, ((0, M_pad - M), (0, 0))).astype(matmul_dtype)

    # weight (Cin, Cout, kH, kW) -> columns ordered (kh, kw, c): j = (kh*kW + kw)*Cout + c
    wf = jnp.transpose(weight, (0, 2, 3, 1)).reshape(Cin, Ncols)
    wf = jnp.pad(wf, ((0, 0), (0, Ncols_pad - Ncols))).astype(matmul_dtype)

    cp_red = pltpu.CompilerParams(dimension_semantics=("arbitrary",),
                                  vmem_limit_bytes=_VMEM_LIMIT)
    cp_par = pltpu.CompilerParams(dimension_semantics=("parallel",),
                                  vmem_limit_bytes=_VMEM_LIMIT)

    # Pass 1: cross-tile sum / sum-of-squares accumulation (reduction axis -> "arbitrary").
    stats = pl.pallas_call(
        _stats_matmul_kernel,
        out_shape=jax.ShapeDtypeStruct((2, Ncols_pad), jnp.float32),
        grid=(n_tiles,),
        in_specs=[pl.BlockSpec((tm, Cin), lambda i: (i, 0)),
                  pl.BlockSpec((Cin, Ncols_pad), lambda i: (0, 0))],
        out_specs=pl.BlockSpec((2, Ncols_pad), lambda i: (0, 0)),
        compiler_params=cp_red,
    )(x2d, wf)

    # Fold BatchNorm (batch statistics, biased variance == track_running_stats=False)
    # into per-column scale/bias.  Tiny (C,)-sized math -> plain JAX.
    count = jnp.float32(N * H_out * W_out)                     # == M * kH * kW
    ch_sum = jnp.sum(stats[0, :Ncols].reshape(kH * kW, Cout), axis=0)
    ch_sq = jnp.sum(stats[1, :Ncols].reshape(kH * kW, Cout), axis=0)
    mean = ch_sum / count
    var = jnp.maximum(ch_sq / count - mean * mean, 0.0)
    scale_c, bias_c = _fold_bn(gamma, beta, mean, var)
    scale_cols = jnp.pad(jnp.tile(scale_c, kH * kW), (0, Ncols_pad - Ncols)).reshape(1, Ncols_pad)
    bias_cols = jnp.pad(jnp.tile(bias_c, kH * kW), (0, Ncols_pad - Ncols)).reshape(1, Ncols_pad)

    # Pass 2: recompute matmul tile, fused BN affine + ReLU, lane-dense write ("parallel").
    out2d = pl.pallas_call(
        _matmul_bn_relu_kernel,
        out_shape=jax.ShapeDtypeStruct((M_pad, Ncols_pad), jnp.float32),
        grid=(n_tiles,),
        in_specs=[pl.BlockSpec((tm, Cin), lambda i: (i, 0)),
                  pl.BlockSpec((Cin, Ncols_pad), lambda i: (0, 0)),
                  pl.BlockSpec((1, Ncols_pad), lambda i: (0, 0)),
                  pl.BlockSpec((1, Ncols_pad), lambda i: (0, 0))],
        out_specs=pl.BlockSpec((tm, Ncols_pad), lambda i: (i, 0)),
        compiler_params=cp_par,
    )(x2d, wf, scale_cols, bias_cols)

    # Dropout is identity at inference time.
    # TODO(synk): training-mode dropout with PyTorch-matching RNG not reproduced.

    # col2im for stride == kernel is a pure reshape/transpose (single layout pass to NCHW).
    cols6 = out2d[:M, :Ncols].reshape(N, H, W, kH, kW, Cout)
    z = jnp.transpose(cols6, (0, 5, 1, 3, 2, 4)).reshape(N, Cout, H_out, W_out)
    return z


def _up_block_general(x, weight, gamma, beta, stride, row_tile, matmul_dtype):
    """Fallback for stride != kernel (overlapping / gapped patches): Pallas matmul ->
    plain-JAX scatter-add col2im -> tiled Pallas BN stats + BN apply."""
    N, Cin, H, W = x.shape
    _, Cout, kH, kW = weight.shape
    H_out = (H - 1) * stride + kH
    W_out = (W - 1) * stride + kW
    M = N * H * W
    Ncols = Cout * kH * kW
    Ncols_pad = _round_up(Ncols, 128)
    tm = min(_round_up(row_tile, 8), _round_up(M, 8))
    M_pad = _round_up(M, tm)

    x2d = jnp.transpose(x, (0, 2, 3, 1)).reshape(M, Cin)
    x2d = jnp.pad(x2d, ((0, M_pad - M), (0, 0))).astype(matmul_dtype)
    wf = jnp.transpose(weight, (0, 2, 3, 1)).reshape(Cin, Ncols)
    wf = jnp.pad(wf, ((0, 0), (0, Ncols_pad - Ncols))).astype(matmul_dtype)

    cp_par = pltpu.CompilerParams(dimension_semantics=("parallel",),
                                  vmem_limit_bytes=_VMEM_LIMIT)
    cp_red = pltpu.CompilerParams(dimension_semantics=("arbitrary",),
                                  vmem_limit_bytes=_VMEM_LIMIT)

    cols = pl.pallas_call(
        _matmul_kernel,
        out_shape=jax.ShapeDtypeStruct((M_pad, Ncols_pad), jnp.float32),
        grid=(M_pad // tm,),
        in_specs=[pl.BlockSpec((tm, Cin), lambda i: (i, 0)),
                  pl.BlockSpec((Cin, Ncols_pad), lambda i: (0, 0))],
        out_specs=pl.BlockSpec((tm, Ncols_pad), lambda i: (i, 0)),
        compiler_params=cp_par,
    )(x2d, wf)

    cols6 = cols[:M, :Ncols].reshape(N, H, W, kH, kW, Cout)
    y = jnp.zeros((N, Cout, H_out, W_out), jnp.float32)
    for kh in range(kH):                                   # small static loop
        for kw in range(kW):
            patch = jnp.transpose(cols6[:, :, :, kh, kw, :], (0, 3, 1, 2))
            y = y.at[:, :, kh:kh + H * stride:stride,
                           kw:kw + W * stride:stride].add(patch)

    M2 = N * H_out * W_out
    tm2 = min(_round_up(row_tile, 8), _round_up(M2, 8))
    M2_pad = _round_up(M2, tm2)
    y2d = jnp.transpose(y, (0, 2, 3, 1)).reshape(M2, Cout)
    y2d = jnp.pad(y2d, ((0, M2_pad - M2), (0, 0)))

    stats = pl.pallas_call(
        _bn_stats_kernel,
        out_shape=jax.ShapeDtypeStruct((2, Cout), jnp.float32),
        grid=(M2_pad // tm2,),
        in_specs=[pl.BlockSpec((tm2, Cout), lambda i: (i, 0))],
        out_specs=pl.BlockSpec((2, Cout), lambda i: (0, 0)),
        compiler_params=cp_red,
    )(y2d)

    mean = stats[0] / M2
    var = jnp.maximum(stats[1] / M2 - mean * mean, 0.0)
    scale_c, bias_c = _fold_bn(gamma, beta, mean, var)

    z2d = pl.pallas_call(
        _bn_apply_kernel,
        out_shape=jax.ShapeDtypeStruct((M2_pad, Cout), jnp.float32),
        grid=(M2_pad // tm2,),
        in_specs=[pl.BlockSpec((tm2, Cout), lambda i: (i, 0)),
                  pl.BlockSpec((1, Cout), lambda i: (0, 0)),
                  pl.BlockSpec((1, Cout), lambda i: (0, 0))],
        out_specs=pl.BlockSpec((tm2, Cout), lambda i: (i, 0)),
        compiler_params=cp_par,
    )(y2d, scale_c.reshape(1, Cout), bias_c.reshape(1, Cout))

    return jnp.transpose(z2d[:M2].reshape(N, H_out, W_out, Cout), (0, 3, 1, 2))


def up_block_forward(x, weight, gamma, beta, stride, *, row_tile=2048,
                     matmul_dtype=jnp.float32):
    """UpBlock forward.  x: (N, C_in, H, W) NCHW; weight: (C_in, C_out, kH, kW)
    (PyTorch ConvTranspose2d layout).  row_tile rows x 128k-lane output tiles,
    well under the explicit 32 MiB VMEM budget on every TPU generation.
    matmul_dtype=jnp.bfloat16 is the recommended setting for large channel counts
    on v6e/v7x (halves A/B DMA bytes, 918/996 TF/s MXU); kept f32 here so the
    tight reference tolerance holds for tiny C_in."""
    N, Cin, H, W = x.shape
    Cin_w, Cout, kH, kW = weight.shape
    assert Cin == Cin_w
    if stride == kH == kW:
        return _up_block_fused(x, weight, gamma, beta, row_tile, matmul_dtype)
    return _up_block_general(x, weight, gamma, beta, stride, row_tile, matmul_dtype)


# ----------------------- reference (pure JAX) -----------------------

def reference_forward(x, weight, gamma, beta, stride):
    N, Cin, H, W = x.shape
    _, Cout, kH, kW = weight.shape
    H_out = (H - 1) * stride + kH
    W_out = (W - 1) * stride + kW
    cols = jnp.einsum('nchw,cdkl->nhwdkl', x.astype(jnp.float32),
                      weight.astype(jnp.float32), precision=lax.Precision.HIGHEST)
    y = jnp.zeros((N, Cout, H_out, W_out), jnp.float32)
    for kh in range(kH):
        for kw in range(kW):
            patch = jnp.transpose(cols[:, :, :, :, kh, kw], (0, 3, 1, 2))
            y = y.at[:, :, kh:kh + H * stride:stride,
                           kw:kw + W * stride:stride].add(patch)
    mean = jnp.mean(y, axis=(0, 2, 3), keepdims=True)
    var = jnp.var(y, axis=(0, 2, 3), keepdims=True)      # biased, like PyTorch BN
    yhat = (y - mean) / jnp.sqrt(var + EPS)
    yhat = yhat * gamma.reshape(1, -1, 1, 1) + beta.reshape(1, -1, 1, 1)
    return jnp.maximum(yhat, 0.0)


# ----------------------- main -----------------------

if __name__ == "__main__":
    # UpBlock(in=4, out=8, kernel=2, stride=2, dropout=0.1) on a small input.
    N, Cin, H, W = 2, 4, 16, 16
    Cout, kH, kW, stride = 8, 2, 2, 2

    key = jax.random.PRNGKey(0)
    kx, kw_, kg, kb = jax.random.split(key, 4)
    x = jax.random.normal(kx, (N, Cin, H, W), dtype=jnp.float32)
    # ConvTranspose2d weight layout in PyTorch: (in_channels, out_channels, kH, kW)
    weight = jax.random.normal(kw_, (Cin, Cout, kH, kW), dtype=jnp.float32) * 0.2
    gamma = 1.0 + 0.1 * jax.random.normal(kg, (Cout,), dtype=jnp.float32)
    beta = 0.1 * jax.random.normal(kb, (Cout,), dtype=jnp.float32)

    # row_tile=128 so the test exercises a multi-tile grid (M = N*H*W = 512 -> 4 tiles)
    # and the cross-tile statistics accumulator.
    out = up_block_forward(x, weight, gamma, beta, stride, row_tile=128)
    out = jax.block_until_ready(out)

    ref = jax.block_until_ready(reference_forward(x, weight, gamma, beta, stride))
    np.testing.assert_allclose(np.asarray(out), np.asarray(ref), rtol=2e-3, atol=2e-3)

    print("KERNEL_OK")
</pallas_src>

<mosaic_0001>
module attributes {stable_mosaic.version = 11 : i64} {
  func.func @_stats_matmul_kernel(%arg0: i32, %arg1: memref<128x4xf32, #tpu.memory_space<vmem>>, %arg2: memref<4x128xf32, #tpu.memory_space<vmem>>, %arg3: memref<2x128xf32, #tpu.memory_space<vmem>>) attributes {dimension_semantics = [#tpu.dimension_semantics<arbitrary>], iteration_bounds = array<i64: 4>, scalar_prefetch = 0 : i64, scratch_operands = 0 : i64, tpu.core_type = #tpu.core_type<tc>, window_params = [{transform_indices = @transform_0, window_bounds = array<i64: 128, 4>}, {pipeline_mode = #tpu.pipeline_mode<synchronous>, transform_indices = @transform_1, window_bounds = array<i64: 4, 128>}, {pipeline_mode = #tpu.pipeline_mode<synchronous>, transform_indices = @transform_2, window_bounds = array<i64: 2, 128>}]} {
    %c0_i32 = arith.constant 0 : i32
    %0 = arith.cmpi eq, %arg0, %c0_i32 : i32
    %1 = arith.extui %0 : i1 to i32
    %c0_i32_0 = arith.constant 0 : i32
    %2 = arith.cmpi ne, %1, %c0_i32_0 : i32
    scf.if %2 {
      %cst_10 = arith.constant 0.000000e+00 : f32
      %15 = vector.broadcast %cst_10 : f32 to vector<2x128xf32>
      %c0_11 = arith.constant 0 : index
      %c0_12 = arith.constant 0 : index
      %16 = vector.load %arg3[%c0_11, %c0_12] : memref<2x128xf32, #tpu.memory_space<vmem>>, vector<2x128xf32>
      tpu.vector_store %arg3[%c0_11, %c0_12], %15 {strides = array<i32>} : memref<2x128xf32, #tpu.memory_space<vmem>>, vector<2x128xf32>,
    } else {
    }
    %c0 = arith.constant 0 : index
    %c0_1 = arith.constant 0 : index
    %3 = vector.load %arg1[%c0, %c0_1] : memref<128x4xf32, #tpu.memory_space<vmem>>, vector<128x4xf32>
    %c0_2 = arith.constant 0 : index
    %c0_3 = arith.constant 0 : index
    %4 = vector.load %arg2[%c0_2, %c0_3] : memref<4x128xf32, #tpu.memory_space<vmem>>, vector<4x128xf32>
    %cst = arith.constant dense<0.000000e+00> : vector<128x128xf32>
    %5 = tpu.matmul %3, %4, %cst {dimension_numbers = #tpu.dot_dimension_numbers<[1], [0], [0], [1], [0, 0, 1, 1], [], []>} : vector<128x4xf32>, vector<4x128xf32>, vector<128x128xf32> -> vector<128x128xf32>
    %cst_4 = arith.constant dense<0.000000e+00> : vector<128xf32>
    %6 = vector.multi_reduction <add>, %5, %cst_4 [0] : vector<128x128xf32> to vector<128xf32>
    %7 = vector.shape_cast %6 : vector<128xf32> to vector<1x128xf32>
    %8 = arith.mulf %5, %5 : vector<128x128xf32>
    %cst_5 = arith.constant dense<0.000000e+00> : vector<128xf32>
    %9 = vector.multi_reduction <add>, %8, %cst_5 [0] : vector<128x128xf32> to vector<128xf32>
    %10 = vector.shape_cast %9 : vector<128xf32> to vector<1x128xf32>
    %c0_6 = arith.constant 0 : index
    %c0_7 = arith.constant 0 : index
    %11 = vector.load %arg3[%c0_6, %c0_7] : memref<2x128xf32, #tpu.memory_space<vmem>>, vector<2x128xf32>
    %12 = tpu.concatenate %7, %10 in 0 : vector<1x128xf32>, vector<1x128xf32> -> vector<2x128xf32>
    %13 = arith.addf %11, %12 : vector<2x128xf32>
    %c0_8 = arith.constant 0 : index
    %c0_9 = arith.constant 0 : index
    %14 = vector.load %arg3[%c0_8, %c0_9] : memref<2x128xf32, #tpu.memory_space<vmem>>, vector<2x128xf32>
    tpu.vector_store %arg3[%c0_8, %c0_9], %13 {strides = array<i32>} : memref<2x128xf32, #tpu.memory_space<vmem>>, vector<2x128xf32>,
    return
  }
  func.func @transform_0(%arg0: i32) -> (i32, i32) {
    %c0_i32 = arith.constant 0 : i32
    %c0_i32_0 = arith.constant 0 : i32
    return %arg0, %c0_i32 : i32, i32
  }
  func.func @transform_1(%arg0: i32) -> (i32, i32) {
    %c0_i32 = arith.constant 0 : i32
    %c0_i32_0 = arith.constant 0 : i32
    %c0_i32_1 = arith.constant 0 : i32
    return %c0_i32, %c0_i32_0 : i32, i32
  }
  func.func @transform_2(%arg0: i32) -> (i32, i32) {
    %c0_i32 = arith.constant 0 : i32
    %c0_i32_0 = arith.constant 0 : i32
    %c0_i32_1 = arith.constant 0 : i32
    return %c0_i32, %c0_i32_0 : i32, i32
  }
}

</mosaic_0001>

<bundles_post_ra>
// kernel: tpu_custom_call.1
= control target key start
LH: loop header
LB: loop body
LE: loop exit
PB: predicated region body
PF: predicated region fallthrough
CT: control target
= control target key end

     0   :  { %7 = vsyncpa [#allocation3], 0  ;;  %s605_s9 = smov 0   ;;  %s683_s0 = inlined_call_operand.vmem [shape: f32[512,4], index: 0, kind: input, shape index: {}]   ;;  %s684_s1 = inlined_call_operand.vmem [shape: f32[4,128], index: 1, kind: input, shape index: {}]   ;;  %s685_s2 = inlined_call_operand.hbm [shape: f32[2,128], index: 2, kind: output, shape index: {}]  }
   0x1 LB: > { %s611_s10 = sadd.s32 4294967295, %s586_s9   ;;  %p464_p0 = scmp.ge.s32.totalorder %s586_s9, 1  ;;  %s586_s9 = sphi %s605_s9, %s13_s9  }
   0x2   : > { %p109_p1 = scmp.lt.s32.totalorder %s586_s9, 5 }
   0x4   : > { %p110_p2 = pnand %p464_p0, %p109_p1 }
   0x5   : > { %s465_s11 = sshll.u32 (!%p110_p2), %s611_s10, 4  ;;  %p467_p4 = scmp.ne.s32.totalorder (!%p110_p2), %s611_s10, 0 }
   0x6   : > { %113 = sbr.rel (%p110_p2) target bundleno = 300 (0x12c), region = 28  ;;  %p127_p3 = scmp.lt.s32.totalorder (!%p110_p2), %s465_s11, 63 }
   0xd   : > { %s687_s11 = smov (!%p127_p3, %s465_s11), 63  ;;  %135 = sbr.rel (%p467_p4) target bundleno = 20 (0x14), region = 32 }
   0xe   : > { %s466_s12 = sshll.u32 %s687_s11, 3  ;;  %v588_v0 = vmov (!%p467_p4), 0.0  }
   0xf   : > { %s619_s15 = scalar_lea.vmem %s683_s0, %s466_s12  ;;  %136 = vst [vmem:[#allocation2] sm:$0x3] (!%p467_p4), %v588_v0 }
  0x14 PF: > { %v153_v1 = vld [vmem:[%s684_s1] sm:$0xf]  ;;  %vm203_vm0 = vcmask 1043456   ;;  %vm154_vm1 = vcmask 31744   ;;  %v138_v3 = vld [vmem:[%s619_s15 + $0x8] sm:$0xff]  ;;  %v139_v4 = vld [vmem:[%s619_s15 + $0x10] sm:$0xff] }
  0x15   : > { %v137_v2 = vld [vmem:[%s619_s15] sm:$0xff]  ;;  %506 = vmatprep.subr.msk.mxu0 %vm203_vm0, %v153_v1  ;;  %532 = vmatprep.subr.msk.mxu1 %vm203_vm0, %v153_v1  ;;  %v146_v6 = vld [vmem:[%s619_s15 + $0x48] sm:$0xff]  ;;  %v147_v7 = vld [vmem:[%s619_s15 + $0x50] sm:$0xff]  ;;  %vm411_vm2 = vcmask 1040384   ;;  %s589_s18 = smov [#allocation2]   ;;  %p538_p5 = scmp.eq.s32.totalorder %s611_s10, 3 }
  0x16   : > { %508 = vmatprep.mubr.msk.f32.mxu0 %vm154_vm1, %v137_v2  ;;  %507 = vmatpush3.msk.msra.mxu0 %vm203_vm0, %v153_v1  ;;  %v145_v5 = vld [vmem:[%s619_s15 + $0x40] sm:$0xff]  ;;  %v140_v8 = vld [vmem:[%s619_s15 + $0x18] sm:$0xff]  ;;  %v142_v12 = vld [vmem:[%s619_s15 + $0x28] sm:$0xff]  ;;  %s422_s19 = sshll.u32 %s589_s18, 4  ;;  %s423_s19 = int_to_ptr.vmem [resolvable:$true] %s422_s19 }
  0x17   : > { %509 = vmatmul.mubr.msk.f32.vlgmr.msra.gmra.mrb[0].mxu0 %vm154_vm1, %v138_v3  ;;  %533 = vmatpush3.msk.msra.mxu1 %vm203_vm0, %v153_v1  ;;  %v141_v9 = vld [vmem:[%s619_s15 + $0x20] sm:$0xff]  ;;  %v148_v10 = vld [vmem:[%s619_s15 + $0x58] sm:$0xff]  ;;  %v143_v13 = vld [vmem:[%s619_s15 + $0x30] sm:$0xff]  ;;  %s550_s20 = scalar_lea.vmem %s423_s19, 32  ;;  %p557_p9 = scmp.lt.s32.totalorder %s423_s19, %s423_s19 }
  0x18   : > { %511 = vmatprep.mubr.msk.f32.mxu0 %vm154_vm1, %v139_v4  ;;  %520 = vmatprep.mubr.msk.f32.mxu1 %vm154_vm1, %v145_v5  ;;  %v149_v11 = vld [vmem:[%s619_s15 + $0x60] sm:$0xff]  ;;  %v150_v14 = vld [vmem:[%s619_s15 + $0x68] sm:$0xff]  ;;  %v151_v15 = vld [vmem:[%s619_s15 + $0x70] sm:$0xff]  ;;  %p551_p6 = scmp.ne.s32.totalorder %s423_s19, %s550_s20  ;;  %p558_p10 = scmp.lt.s32.totalorder %s550_s20, %s550_s20 }
  0x19   : > { %521 = vmatmul.mubr.msk.f32.vlgmr.msra.gmra.mrb[0].mxu1 %vm154_vm1, %v146_v6  ;;  %v144_v16 = vld [vmem:[%s619_s15 + $0x38] sm:$0xff] }
  0x1a   : > { %523 = vmatprep.mubr.msk.f32.mxu1 %vm154_vm1, %v147_v7  ;;  %v152_v17 = vld [vmem:[%s619_s15 + $0x78] sm:$0xff]  ;;  %p552_p7 = pnand %p551_p6, %p538_p5  ;;  %p559_p11 = por %p558_p10, %p557_p9 }
  0x1b   : > { %512 = vmatmul.mubr.msk.f32.gmra.mrb[2].mxu0 %vm154_vm1, %v140_v8 }
  0x1c   : > { %514 = vmatprep.mubr.msk.f32.mxu0 %vm154_vm1, %v141_v9  ;;  %p553_p8 = pneg %p552_p7 }
  0x1d   : > { %524 = vmatmul.mubr.msk.f32.gmra.mrb[2].mxu1 %vm154_vm1, %v148_v10 }
  0x1e   : > { %526 = vmatprep.mubr.msk.f32.mxu1 %vm154_vm1, %v149_v11  ;;  %p560_p12 = pnand %p559_p11, %p553_p8 }
  0x1f   : > { %515 = vmatmul.mubr.msk.f32.gmra.mrb[4].mxu0 %vm154_vm1, %v142_v12 }
  0x20   : > { %517 = vmatprep.mubr.msk.f32.mxu0 %vm154_vm1, %v143_v13 }
  0x21   : > { %527 = vmatmul.mubr.msk.f32.gmra.mrb[4].mxu1 %vm154_vm1, %v150_v14 }
  0x22   : > { %529 = vmatprep.mubr.msk.f32.mxu1 %vm154_vm1, %v151_v15 }
  0x23   : > { %518 = vmatmul.mubr.msk.f32.gmra.mrb[6].mxu0 %vm154_vm1, %v144_v16 }
  0x25   : > { %530 = vmatmul.mubr.msk.f32.gmra.mrb[6].mxu1 %vm154_vm1, %v152_v17 }
  0xea   : > { %v510_v18 = vpop.f32.mrb[0].mxu0 }
  0xeb   : > { %v374_v19 = vmul.f32 %v510_v18, %v510_v18  ;;  %v273_v20 = vpop.f32.mrb[1].mxu0 }
  0xec   : > { %v352_v21 = vadd.f32 %v510_v18, %v273_v20  ;;  %v373_v22 = vmul.f32 %v273_v20, %v273_v20  ;;  %v522_v23 = vpop.f32.mrb[0].mxu1 }
  0xed   : > { %v313_v24 = vpop.f32.mrb[1].mxu1  ;;  %v382_v58 = vmul.f32 %v522_v23, %v522_v23 }
  0xee   : > { %v389_v25 = vadd.f32 %v374_v19, %v373_v22  ;;  %v513_v26 = vpop.f32.mrb[2].mxu0  ;;  %v381_v55 = vmul.f32 %v313_v24, %v313_v24 }
  0xef   : > { %v283_v27 = vpop.f32.mrb[3].mxu0  ;;  %v376_v32 = vmul.f32 %v513_v26, %v513_v26 }
  0xf0   : > { %v353_v28 = vadd.f32 %v352_v21, %v283_v27  ;;  %v375_v29 = vmul.f32 %v283_v27, %v283_v27  ;;  %v525_v30 = vpop.f32.mrb[2].mxu1 }
  0xf1   : > { %v323_v31 = vpop.f32.mrb[3].mxu1  ;;  %v384_v0 = vmul.f32 %v525_v30, %v525_v30 }
  0xf2   : > { %v390_v33 = vadd.f32 %v389_v25, %v375_v29  ;;  %v516_v34 = vpop.f32.mrb[4].mxu0  ;;  %v354_v35 = vadd.f32 %v513_v26, %v353_v28  ;;  %v383_v61 = vmul.f32 %v323_v31, %v323_v31  ;;  %v410_v28 = vld [vmem:[#allocation2] sm:$0x3] }
  0xf3   : > { %v293_v36 = vpop.f32.mrb[5].mxu0  ;;  %v378_v42 = vmul.f32 %v516_v34, %v516_v34 }
  0xf4   : > { %v355_v37 = vadd.f32 %v354_v35, %v293_v36  ;;  %v377_v38 = vmul.f32 %v293_v36, %v293_v36  ;;  %v391_v39 = vadd.f32 %v390_v33, %v376_v32  ;;  %v528_v40 = vpop.f32.mrb[4].mxu1 }
  0xf5   : > { %v333_v41 = vpop.f32.mrb[5].mxu1  ;;  %v386_v6 = vmul.f32 %v528_v40, %v528_v40 }
  0xf6   : > { %v392_v43 = vadd.f32 %v391_v39, %v377_v38  ;;  %v519_v44 = vpop.f32.mrb[6].mxu0  ;;  %v356_v45 = vadd.f32 %v516_v34, %v355_v37  ;;  %v385_v3 = vmul.f32 %v333_v41, %v333_v41 }
  0xf7   : > { %v303_v46 = vpop.f32.mrb[7].mxu0  ;;  %v380_v52 = vmul.f32 %v519_v44, %v519_v44 }
  0xf8   : > { %v357_v47 = vadd.f32 %v356_v45, %v303_v46  ;;  %v379_v48 = vmul.f32 %v303_v46, %v303_v46  ;;  %v393_v49 = vadd.f32 %v392_v43, %v378_v42  ;;  %v531_v50 = vpop.f32.mrb[6].mxu1 }
  0xf9   : > { %v343_v51 = vpop.f32.mrb[7].mxu1  ;;  %v388_v12 = vmul.f32 %v531_v50, %v531_v50 }
  0xfa   : > { %v358_v53 = vadd.f32 %v519_v44, %v357_v47  ;;  %v394_v54 = vadd.f32 %v393_v49, %v379_v48  ;;  %v387_v9 = vmul.f32 %v343_v51, %v343_v51 }
  0xfc   : > { %v395_v56 = vadd.f32 %v394_v54, %v380_v52  ;;  %v359_v57 = vadd.f32 %v358_v53, %v313_v24 }
  0xfe   : > { %v396_v59 = vadd.f32 %v395_v56, %v381_v55  ;;  %v360_v60 = vadd.f32 %v522_v23, %v359_v57 }
 0x100   : > { %v361_v62 = vadd.f32 %v360_v60, %v323_v31  ;;  %v397_v63 = vadd.f32 %v396_v59, %v382_v58 }
 0x102   : > { %v398_v1 = vadd.f32 %v397_v63, %v383_v61  ;;  %v362_v2 = vadd.f32 %v525_v30, %v361_v62 }
 0x104   : > { %v363_v4 = vadd.f32 %v362_v2, %v333_v41  ;;  %v399_v5 = vadd.f32 %v398_v1, %v384_v0 }
 0x106   : > { %v400_v7 = vadd.f32 %v399_v5, %v385_v3  ;;  %v364_v8 = vadd.f32 %v528_v40, %v363_v4 }
 0x108   : > { %v365_v10 = vadd.f32 %v364_v8, %v343_v51  ;;  %v401_v11 = vadd.f32 %v400_v7, %v386_v6 }
 0x10a   : > { %v366_v13 = vadd.f32 %v531_v50, %v365_v10  ;;  %v402_v14 = vadd.f32 %v401_v11, %v387_v9 }
 0x10c   : > { %v367_v15 = vrot.slane %v366_v13, 4  ;;  %v403_v16 = vadd.f32 %v402_v14, %v388_v12 }
 0x10e   : > { %v368_v17 = vadd.f32 %v367_v15, %v366_v13  ;;  %v404_v18 = vrot.slane %v403_v16, 4 }
 0x110   : > { %v369_v19 = vrot.slane %v368_v17, 2  ;;  %v405_v20 = vadd.f32 %v404_v18, %v403_v16 }
 0x112   : > { %v370_v21 = vadd.f32 %v369_v19, %v368_v17  ;;  %v406_v22 = vrot.slane %v405_v20, 2 }
 0x114   : > { %v371_v23 = vrot.slane %v370_v21, 1  ;;  %v407_v24 = vadd.f32 %v406_v22, %v405_v20 }
 0x116   : > { %v408_v25 = vrot.slane %v407_v24, 1  ;;  %v372_v26 = vadd.f32 %v371_v23, %v370_v21 }
 0x118   : > { %v409_v27 = vadd.f32 %v408_v25, %v407_v24 }
 0x11a   : > { %v412_v29 = vsel %vm411_vm2, %v372_v26, %v409_v27 }
 0x11b   : > { %v413_v30 = vadd.f32 %v412_v29, %v410_v28 }
 0x11d   : > { %414 = vst [vmem:[#allocation2] sm:$0x3] %v413_v30 }
 0x11e   : > { %563 = shalt.err (!%p560_p12)
}
 0x11f   : > { %s564_s23 = scalar_lea.hbm %s685_s2, 32 }
 0x120   : > { %p565_p13 = scmp.ne.s32.totalorder %s685_s2, %s564_s23  ;;  %p570_p2 = scmp.lt.u32.totalorder %s564_s23, %s685_s2 }
 0x122   : > { %p566_p0 = pnand %p565_p13, %p538_p5 }
 0x124   : > { %p567_p1 = pneg %p566_p0 }
 0x126   : > { %p572_p3 = pnand %p570_p2, %p567_p1 }
 0x128   : > { %575 = shalt.err (!%p572_p3)
}
 0x129   : > { %535 = dma.vmem_to_hbm [thread:$0]  (%p538_p5), %s423_s19, 32, %s685_s2, [#allocation3]  }
 0x12a   : > { %581 = dma.done.wait (%p538_p5), [#allocation3], 32  }
 0x12b   : > { %583 = vsyncadd (%p538_p5), [#allocation3], 4294967264 }
 0x12c PF: > { %s13_s9 = sadd.s32 1, %s586_s9  }
 0x12d   : > { %p10_p4 = scmp.ge.s32.totalorder %s13_s9, 6  }
 0x12f   :  { %12 = sbr.rel (!%p10_p4) target bundleno = 1 (0x1), region = 59 }
 0x136   :  { %435 = vsyncpa [#allocation3], 1 }
 0x137   :  { %437 = vsyncpa [#allocation3 + $0x1], 1 }

</bundles_post_ra>
